<compile_context>
chip_gen: v5e
topology: v5e:2x2
jax: 0.10.0
libtpu: 0.0.40
codegen_flags: <defaults>
</compile_context>

<pallas_src>
import jax
import jax.numpy as jnp
from jax.experimental import pallas as pl
from jax.experimental.pallas import tpu as pltpu


def _round_up(x, m):
    return ((x + m - 1) // m) * m


def _pick_rows_per_tile(H, W, max_lanes=512):
    """Pooled rows per grid step.

    Whole image if the pooled image is small; otherwise the smallest row
    count R such that the contiguous input window (2*R*W lanes) is 128-lane
    aligned and the pooled tile (R*W/2 lanes) is reasonably lane-dense.
    """
    Ho, Wo = H // 2, W // 2
    if Ho * Wo <= max_lanes:
        return Ho
    aligned = [r for r in range(1, Ho + 1)
               if (2 * r * W) % 128 == 0 and r * Wo <= max_lanes]
    if not aligned:
        return Ho                      # fallback: whole image per step
    for r in aligned:
        if r * Wo >= 128:
            return r                   # smallest aligned, still lane-dense
    return aligned[-1]


def _transition_kernel(x_ref, scale_ref, bias_ref, w_ref, pool_ref, o_ref):
    # x_ref:     (Cin, window)   contiguous 2R-row slab of one image (lanes)
    # scale_ref: (Cin, 1)        folded BN scale = gamma / sqrt(var + eps)
    # bias_ref:  (Cin, 1)        folded BN bias  = beta - mean * scale
    # w_ref:     (Cout, Cin)     1x1 conv weight
    # pool_ref:  (window, T_pad) shared banded 2x2-average operator (0 / 0.25)
    # o_ref:     (Cout, T_pad)   lane-dense output tile
    x = x_ref[...]
    # Folded BatchNorm + ReLU on the VPU (fp32).
    z = jnp.maximum(x * scale_ref[...] + bias_ref[...], 0.0)       # (Cin, window)

    pm = pool_ref[...]
    wm = w_ref[...]
    z = z.astype(pm.dtype)

    # Pool first (banded MXU matmul), then the 1x1 conv runs on the pooled
    # activation (4x fewer elements than conv-first).
    pooled = jnp.dot(z, pm, preferred_element_type=jnp.float32)    # (Cin, T_pad)
    out = jnp.dot(wm, pooled.astype(wm.dtype),
                  preferred_element_type=jnp.float32)              # (Cout, T_pad)
    o_ref[...] = out.astype(o_ref.dtype)


def transition_forward(x_nchw, gamma, beta, conv_w, eps=1e-5, matmul_dtype=None):
    """x_nchw: (N, Cin, H, W) float32; conv_w: (Cout, Cin, 1, 1)."""
    N, Cin, H, W = x_nchw.shape
    Cout = conv_w.shape[0]
    HW = H * W
    Ho, Wo = H // 2, W // 2
    HWo = Ho * Wo

    # Free row-major reshape, no transpose.
    xf = x_nchw.reshape(N, Cin, HW)

    # ---- one-pass training-mode BN batch statistics (biased var), fp32 ----
    inv_n = 1.0 / (N * HW)
    s1 = jnp.sum(xf, axis=(0, 2))
    s2 = jnp.sum(xf * xf, axis=(0, 2))
    mean = s1 * inv_n
    var = jnp.maximum(s2 * inv_n - mean * mean, 0.0)   # guard fp cancellation
    scale = gamma * jax.lax.rsqrt(var + eps)           # (Cin,)
    bias = beta - mean * scale                         # (Cin,)

    w = conv_w.reshape(Cout, Cin).astype(jnp.float32)

    # ---- banded tiling over pooled rows ----
    R = _pick_rows_per_tile(H, W)          # pooled rows per grid step
    n_tiles = -(-Ho // R)                  # ceil; last tile may be ragged
    T = R * Wo                             # real pooled pixels per tile
    Tp = _round_up(T, 128)                 # lane-dense padded tile width
    window = HW if R == Ho else 2 * R * W  # contiguous input lanes per tile

    # Shared banded 2x2 average-pool operator (identical for every tile):
    # P[i, j] = 0.25 iff input element i of the window feeds pooled pixel j.
    ii = jnp.arange(window)
    hi, wi = ii // W, ii % W               # local input row / col
    jj = jnp.arange(Tp)
    ro, vo = jj // Wo, jj % Wo             # local pooled row / col (pad cols -> 0)
    pool_mat = ((hi[:, None] // 2 == ro[None, :]) &
                (wi[:, None] // 2 == vo[None, :])).astype(jnp.float32) * 0.25

    if matmul_dtype is not None:           # bf16 MXU path for v6e/v7x
        pool_mat = pool_mat.astype(matmul_dtype)   # 0 / 0.25 are exact in bf16
        w = w.astype(matmul_dtype)

    grid = (N, n_tiles)

    out_flat = pl.pallas_call(
        _transition_kernel,
        out_shape=jax.ShapeDtypeStruct((N, Cout, n_tiles * Tp), x_nchw.dtype),
        grid_spec=pltpu.PrefetchScalarGridSpec(
            num_scalar_prefetch=0,
            grid=grid,
            in_specs=[
                pl.BlockSpec((None, Cin, window), lambda n, t: (n, 0, t)),
                pl.BlockSpec((Cin, 1), lambda n, t: (0, 0)),
                pl.BlockSpec((Cin, 1), lambda n, t: (0, 0)),
                pl.BlockSpec((Cout, Cin), lambda n, t: (0, 0)),
                pl.BlockSpec((window, Tp), lambda n, t: (0, 0)),
            ],
            out_specs=pl.BlockSpec((None, Cout, Tp), lambda n, t: (n, 0, t)),
        ),
        compiler_params=pltpu.CompilerParams(
            dimension_semantics=("parallel", "parallel")),
    )(xf, scale.reshape(Cin, 1), bias.reshape(Cin, 1), w, pool_mat)

    # Drop the 128-lane padding and (for ragged last tiles) padded rows, then
    # reshape back to NCHW spatial layout.  Cheap: the output is 4x smaller
    # than the input.
    out = out_flat.reshape(N, Cout, n_tiles, Tp)[:, :, :, :T]
    out = out.reshape(N, Cout, n_tiles * R, Wo)[:, :, :Ho, :]
    return out


def reference_forward(x_nchw, gamma, beta, conv_w, eps=1e-5):
    """Pure-JAX reference of the PyTorch forward (training-mode BN)."""
    mean = jnp.mean(x_nchw, axis=(0, 2, 3))
    var = jnp.mean((x_nchw - mean[None, :, None, None]) ** 2, axis=(0, 2, 3))
    xh = (x_nchw - mean[None, :, None, None]) / jnp.sqrt(var + eps)[None, :, None, None]
    xh = xh * gamma[None, :, None, None] + beta[None, :, None, None]
    xh = jnp.maximum(xh, 0.0)
    y = jnp.einsum('nchw,oc->nohw', xh,
                   conv_w.reshape(conv_w.shape[0], conv_w.shape[1]))
    N, Co, H, W = y.shape
    y = y.reshape(N, Co, H // 2, 2, W // 2, 2).mean(axis=(3, 5))
    return y


if __name__ == "__main__":
    key = jax.random.PRNGKey(0)
    k_x, k_w = jax.random.split(key)

    N, Cin, H, W = 2, 8, 16, 16
    Cout = 4

    x = jax.random.normal(k_x, (N, Cin, H, W), dtype=jnp.float32)

    # BatchNorm2d default init: gamma=1, beta=0
    gamma = jnp.ones((Cin,), dtype=jnp.float32)
    beta = jnp.zeros((Cin,), dtype=jnp.float32)
    conv_w = 0.1 * jax.random.normal(k_w, (Cout, Cin, 1, 1), dtype=jnp.float32)

    fwd = jax.jit(transition_forward)
    out = jax.block_until_ready(fwd(x, gamma, beta, conv_w))

    ref = reference_forward(x, gamma, beta, conv_w)
    assert out.shape == (N, Cout, H // 2, W // 2), out.shape
    assert jnp.allclose(out, ref, atol=1e-4, rtol=1e-4), float(jnp.max(jnp.abs(out - ref)))

    print("KERNEL_OK")
</pallas_src>

<mosaic_0001>
module attributes {stable_mosaic.version = 11 : i64} {
  func.func @_transition_kernel(%arg0: i32, %arg1: i32, %arg2: memref<1x8x256xf32, #tpu.memory_space<vmem>>, %arg3: memref<8x1xf32, #tpu.memory_space<vmem>>, %arg4: memref<8x1xf32, #tpu.memory_space<vmem>>, %arg5: memref<4x8xf32, #tpu.memory_space<vmem>>, %arg6: memref<256x128xf32, #tpu.memory_space<vmem>>, %arg7: memref<1x4x128xf32, #tpu.memory_space<vmem>>) attributes {dimension_semantics = [#tpu.dimension_semantics<parallel>, #tpu.dimension_semantics<parallel>], iteration_bounds = array<i64: 2, 1>, scalar_prefetch = 0 : i64, scratch_operands = 0 : i64, tpu.core_type = #tpu.core_type<tc>, window_params = [{transform_indices = @transform_0, window_bounds = array<i64: 1, 8, 256>}, {pipeline_mode = #tpu.pipeline_mode<synchronous>, transform_indices = @transform_1, window_bounds = array<i64: 8, 1>}, {pipeline_mode = #tpu.pipeline_mode<synchronous>, transform_indices = @transform_2, window_bounds = array<i64: 8, 1>}, {pipeline_mode = #tpu.pipeline_mode<synchronous>, transform_indices = @transform_3, window_bounds = array<i64: 4, 8>}, {pipeline_mode = #tpu.pipeline_mode<synchronous>, transform_indices = @transform_4, window_bounds = array<i64: 256, 128>}, {transform_indices = @transform_5, window_bounds = array<i64: 1, 4, 128>}]} {
    %c0 = arith.constant 0 : index
    %c0_0 = arith.constant 0 : index
    %c0_1 = arith.constant 0 : index
    %0 = vector.load %arg2[%c0, %c0_0, %c0_1] : memref<1x8x256xf32, #tpu.memory_space<vmem>>, vector<1x8x256xf32>
    %1 = vector.shape_cast %0 : vector<1x8x256xf32> to vector<8x256xf32>
    %c0_2 = arith.constant 0 : index
    %c0_3 = arith.constant 0 : index
    %2 = vector.load %arg3[%c0_2, %c0_3] : memref<8x1xf32, #tpu.memory_space<vmem>>, vector<8x1xf32>
    %3 = vector.broadcast %2 : vector<8x1xf32> to vector<8x256xf32>
    %4 = arith.mulf %1, %3 : vector<8x256xf32>
    %c0_4 = arith.constant 0 : index
    %c0_5 = arith.constant 0 : index
    %5 = vector.load %arg4[%c0_4, %c0_5] : memref<8x1xf32, #tpu.memory_space<vmem>>, vector<8x1xf32>
    %6 = vector.broadcast %5 : vector<8x1xf32> to vector<8x256xf32>
    %7 = arith.addf %4, %6 : vector<8x256xf32>
    %cst = arith.constant 0.000000e+00 : f32
    %8 = vector.broadcast %cst : f32 to vector<8x256xf32>
    %9 = arith.maximumf %7, %8 : vector<8x256xf32>
    %c0_6 = arith.constant 0 : index
    %c0_7 = arith.constant 0 : index
    %10 = vector.load %arg6[%c0_6, %c0_7] : memref<256x128xf32, #tpu.memory_space<vmem>>, vector<256x128xf32>
    %c0_8 = arith.constant 0 : index
    %c0_9 = arith.constant 0 : index
    %11 = vector.load %arg5[%c0_8, %c0_9] : memref<4x8xf32, #tpu.memory_space<vmem>>, vector<4x8xf32>
    %cst_10 = arith.constant dense<0.000000e+00> : vector<8x128xf32>
    %12 = tpu.matmul %9, %10, %cst_10 {dimension_numbers = #tpu.dot_dimension_numbers<[1], [0], [0], [1], [0, 0, 1, 1], [], []>} : vector<8x256xf32>, vector<256x128xf32>, vector<8x128xf32> -> vector<8x128xf32>
    %cst_11 = arith.constant dense<0.000000e+00> : vector<4x128xf32>
    %13 = tpu.matmul %11, %12, %cst_11 {dimension_numbers = #tpu.dot_dimension_numbers<[1], [0], [0], [1], [0, 0, 1, 1], [], []>} : vector<4x8xf32>, vector<8x128xf32>, vector<4x128xf32> -> vector<4x128xf32>
    %c0_12 = arith.constant 0 : index
    %c0_13 = arith.constant 0 : index
    %c0_14 = arith.constant 0 : index
    %14 = vector.load %arg7[%c0_12, %c0_13, %c0_14] : memref<1x4x128xf32, #tpu.memory_space<vmem>>, vector<1x4x128xf32>
    %15 = vector.shape_cast %14 : vector<1x4x128xf32> to vector<4x128xf32>
    %16 = vector.shape_cast %13 : vector<4x128xf32> to vector<1x4x128xf32>
    tpu.vector_store %arg7[%c0_12, %c0_13, %c0_14], %16 {strides = array<i32>} : memref<1x4x128xf32, #tpu.memory_space<vmem>>, vector<1x4x128xf32>,
    return
  }
  func.func @transform_0(%arg0: i32, %arg1: i32) -> (i32, i32, i32) {
    %c0_i32 = arith.constant 0 : i32
    %c0_i32_0 = arith.constant 0 : i32
    return %arg0, %c0_i32, %arg1 : i32, i32, i32
  }
  func.func @transform_1(%arg0: i32, %arg1: i32) -> (i32, i32) {
    %c0_i32 = arith.constant 0 : i32
    %c0_i32_0 = arith.constant 0 : i32
    %c0_i32_1 = arith.constant 0 : i32
    return %c0_i32, %c0_i32_0 : i32, i32
  }
  func.func @transform_2(%arg0: i32, %arg1: i32) -> (i32, i32) {
    %c0_i32 = arith.constant 0 : i32
    %c0_i32_0 = arith.constant 0 : i32
    %c0_i32_1 = arith.constant 0 : i32
    return %c0_i32, %c0_i32_0 : i32, i32
  }
  func.func @transform_3(%arg0: i32, %arg1: i32) -> (i32, i32) {
    %c0_i32 = arith.constant 0 : i32
    %c0_i32_0 = arith.constant 0 : i32
    %c0_i32_1 = arith.constant 0 : i32
    return %c0_i32, %c0_i32_0 : i32, i32
  }
  func.func @transform_4(%arg0: i32, %arg1: i32) -> (i32, i32) {
    %c0_i32 = arith.constant 0 : i32
    %c0_i32_0 = arith.constant 0 : i32
    %c0_i32_1 = arith.constant 0 : i32
    return %c0_i32, %c0_i32_0 : i32, i32
  }
  func.func @transform_5(%arg0: i32, %arg1: i32) -> (i32, i32, i32) {
    %c0_i32 = arith.constant 0 : i32
    %c0_i32_0 = arith.constant 0 : i32
    return %arg0, %c0_i32, %arg1 : i32, i32, i32
  }
}

</mosaic_0001>

<bundles_post_ra>
// kernel: transition_forward.1
= control target key start
LH: loop header
LB: loop body
LE: loop exit
PB: predicated region body
PF: predicated region fallthrough
CT: control target
= control target key end

     0   :  { %s547_s18 = smov 0   ;;  %s549_s19 = smov 0   ;;  %s689_s0 = inlined_call_operand.vmem [shape: f32[2,8,256], index: 0, kind: input, shape index: {}]   ;;  %s690_s1 = inlined_call_operand.vmem [shape: f32[8,1], index: 1, kind: input, shape index: {}]   ;;  %s691_s2 = inlined_call_operand.vmem [shape: f32[8,1], index: 2, kind: input, shape index: {}]   ;;  %s692_s3 = inlined_call_operand.vmem [shape: f32[4,8], index: 3, kind: input, shape index: {}]   ;;  %s693_s4 = inlined_call_operand.vmem [shape: f32[256,128], index: 4, kind: input, shape index: {}]   ;;  %s694_s5 = inlined_call_operand.vmem [shape: f32[2,4,128], index: 5, kind: output, shape index: {}]  }
   0x1   :  { %s551_s20 = smov 0  }
   0x2 LB: > { %s27_s21 = sadd.s32 1, %s510_s19  ;;  %p458_p0 = scmp.ge.s32.totalorder %s514_s20, 1  ;;  %s514_s20 = sphi %s551_s20, %s15_s20   ;;  %s510_s19 = sphi %s549_s19, %s696_s19   ;;  %s506_s18 = sphi %s547_s18, %s695_s18  }
   0x3   : > { %p29_p1 = scmp.ge.s32.totalorder %s27_s21, 2  ;;  %p208_p2 = scmp.lt.s32.totalorder %s514_s20, 3 }
   0x5   : > { %s698_s21 = smov (%p29_p1, %s27_s21), 0  ;;  %p209_p3 = pnand %p458_p0, %p208_p2 }
   0x6   : > { %p243_p4 = scmp.lt.s32.totalorder (!%p209_p3), %s506_s18, 1 }
   0x7   : > { %212 = sbr.rel (%p209_p3) target bundleno = 403 (0x193), region = 40 }
   0xc   : > { %v261_v0 = vld [vmem:[%s690_s1] sm:$0xff]  ;;  %v294_v1 = vld [vmem:[%s693_s4 + $0x78] sm:$0xff]  ;;  %v516_v2 = vmov 0   ;;  %v293_v4 = vld [vmem:[%s693_s4 + $0x70] sm:$0xff]  ;;  %s700_s18 = smov (!%p243_p4, %s506_s18), 1  ;;  %vm352_vm0 = vcmask 64512  }
   0xd   : > { %491 = vset.pattern.permute.xlu0 %v516_v2  ;;  %312 = vmatpush.msra.mxu0 %v294_v1  ;;  %v310_v3 = vld [vmem:[%s693_s4 + $0xf8] sm:$0xff]  ;;  %v309_v5 = vld [vmem:[%s693_s4 + $0xf0] sm:$0xff]  ;;  %v292_v6 = vld [vmem:[%s693_s4 + $0x68] sm:$0xff]  ;;  %s465_s27 = sshll.u32 %s700_s18, 4  ;;  %s461_s8 = sshll.u32 %s700_s18, 2 }
   0xe   : > { %264 = vperm.xlu0 %491, %v261_v0   ;;  %332 = vmatpush.msra.mxu1 %v310_v3  ;;  %v308_v7 = vld [vmem:[%s693_s4 + $0xe8] sm:$0xff]  ;;  %v291_v8 = vld [vmem:[%s693_s4 + $0x60] sm:$0xff]  ;;  %v290_v10 = vld [vmem:[%s693_s4 + $0x58] sm:$0xff]  ;;  %s250_s30 = scalar_lea.vmem %s689_s0, %s465_s27  ;;  %s258_s11 = scalar_lea.vmem %s694_s5, %s461_s8 }
   0xf   : > { %313 = vmatpush.msra.mxu0 %v293_v4  ;;  %v307_v9 = vld [vmem:[%s693_s4 + $0xe0] sm:$0xff]  ;;  %v306_v12 = vld [vmem:[%s693_s4 + $0xd8] sm:$0xff]  ;;  %v289_v13 = vld [vmem:[%s693_s4 + $0x50] sm:$0xff] }
  0x10   : > { %333 = vmatpush.msra.mxu1 %v309_v5  ;;  %v269_v11 = vld [vmem:[%s691_s2] sm:$0xff]  ;;  %v305_v14 = vld [vmem:[%s693_s4 + $0xd0] sm:$0xff]  ;;  %v288_v15 = vld [vmem:[%s693_s4 + $0x48] sm:$0xff] }
  0x11   : > { %314 = vmatpush.msra.mxu0 %v292_v6  ;;  %v304_v16 = vld [vmem:[%s693_s4 + $0xc8] sm:$0xff]  ;;  %v287_v17 = vld [vmem:[%s693_s4 + $0x40] sm:$0xff]  ;;  %v286_v19 = vld [vmem:[%s693_s4 + $0x38] sm:$0xff] }
  0x12   : > { %334 = vmatpush.msra.mxu1 %v308_v7  ;;  %v303_v18 = vld [vmem:[%s693_s4 + $0xc0] sm:$0xff]  ;;  %v302_v20 = vld [vmem:[%s693_s4 + $0xb8] sm:$0xff]  ;;  %v285_v21 = vld [vmem:[%s693_s4 + $0x30] sm:$0xff] }
  0x13   : > { %315 = vmatpush.msra.mxu0 %v291_v8  ;;  %v301_v22 = vld [vmem:[%s693_s4 + $0xb0] sm:$0xff]  ;;  %v284_v23 = vld [vmem:[%s693_s4 + $0x28] sm:$0xff]  ;;  %v283_v25 = vld [vmem:[%s693_s4 + $0x20] sm:$0xff] }
  0x14   : > { %335 = vmatpush.msra.mxu1 %v307_v9  ;;  %v300_v24 = vld [vmem:[%s693_s4 + $0xa8] sm:$0xff]  ;;  %v299_v26 = vld [vmem:[%s693_s4 + $0xa0] sm:$0xff]  ;;  %v282_v27 = vld [vmem:[%s693_s4 + $0x18] sm:$0xff] }
  0x15   : > { %316 = vmatpush.msra.mxu0 %v290_v10  ;;  %v298_v28 = vld [vmem:[%s693_s4 + $0x98] sm:$0xff]  ;;  %v281_v29 = vld [vmem:[%s693_s4 + $0x10] sm:$0xff]  ;;  %v280_v31 = vld [vmem:[%s693_s4 + $0x8] sm:$0xff] }
  0x16   : > { %272 = vperm.xlu0 %491, %v269_v11   ;;  %336 = vmatpush.msra.mxu1 %v306_v12  ;;  %v297_v30 = vld [vmem:[%s693_s4 + $0x90] sm:$0xff]  ;;  %v296_v32 = vld [vmem:[%s693_s4 + $0x88] sm:$0xff]  ;;  %v279_v33 = vld [vmem:[%s693_s4] sm:$0xff] }
  0x17   : > { %317 = vmatpush.msra.mxu0 %v289_v13  ;;  %v295_v34 = vld [vmem:[%s693_s4 + $0x80] sm:$0xff]  ;;  %v260_v37 = vld [vmem:[%s250_s30 + $0x8] sm:$0xff] }
  0x18   : > { %337 = vmatpush.msra.mxu1 %v305_v14  ;;  %v259_v36 = vld [vmem:[%s250_s30] sm:$0xff] }
  0x19   : > { %318 = vmatpush.msra.mxu0 %v288_v15  ;;  %v311_v48 = vld [vmem:[%s692_s3] sm:$0xf] }
  0x1a   : > { %338 = vmatpush.msra.mxu1 %v304_v16 }
  0x1b   : > { %319 = vmatpush.msra.mxu0 %v287_v17 }
  0x1c   : > { %339 = vmatpush.msra.mxu1 %v303_v18 }
  0x1d   : > { %320 = vmatpush.msra.mxu0 %v286_v19 }
  0x1e   : > { %340 = vmatpush.msra.mxu1 %v302_v20 }
  0x1f   : > { %321 = vmatpush.msra.mxu0 %v285_v21 }
  0x20   : > { %341 = vmatpush.msra.mxu1 %v301_v22 }
  0x21   : > { %322 = vmatpush.msra.mxu0 %v284_v23 }
  0x22   : > { %342 = vmatpush.msra.mxu1 %v300_v24 }
  0x23   : > { %323 = vmatpush.msra.mxu0 %v283_v25 }
  0x24   : > { %343 = vmatpush.msra.mxu1 %v299_v26 }
  0x25   : > { %324 = vmatpush.msra.mxu0 %v282_v27 }
  0x26   : > { %344 = vmatpush.msra.mxu1 %v298_v28 }
  0x27   : > { %325 = vmatpush.msra.mxu0 %v281_v29 }
  0x28   : > { %345 = vmatpush.msra.mxu1 %v297_v30 }
  0x29   : > { %326 = vmatpush.msra.mxu0 %v280_v31 }
  0x2a   : > { %346 = vmatpush.msra.mxu1 %v296_v32 }
  0x2b   : > { %327 = vmatpush.msra.mxu0 %v279_v33 }
  0x2c   : > { %347 = vmatpush.msra.mxu1 %v295_v34 }
  0x80   : > { %v265_v35 = vpop.permute.xlu0 %264 }
  0x81   : > { %v267_v38 = vmul.f32 %v265_v35, %v259_v36  ;;  %v268_v39 = vmul.f32 %v265_v35, %v260_v37 }
  0x88   : > { %v273_v40 = vpop.permute.xlu0 %272 }
  0x89   : > { %v275_v41 = vadd.f32 %v273_v40, %v267_v38  ;;  %v276_v42 = vadd.f32 %v273_v40, %v268_v39 }
  0x8b   : > { %v277_v43 = vmax.f32 %v275_v41, 0.0  ;;  %v278_v44 = vmax.f32 %v276_v42, 0.0 }
  0x8d   : > { %328 = vmatmul.f32.vlgmr.msra.gmra.mxu0 %v277_v43  ;;  %348 = vmatmul.f32.vlgmr.msra.gmra.mxu1 %v278_v44 }
 0x10a   : > { %v329_v45 = vpop.f32.mrf.mxu0  ;;  %v349_v46 = vpop.f32.mrf.mxu1 }
 0x10b   : > { %v350_v47 = vadd.f32 %v349_v46, %v329_v45 }
 0x10d   : > { %371 = vmatpush.msra.mxu2 %v350_v47 }
 0x10e   : > { %462 = vmatmul.msk.f32.vlgmr.msra.gmra.mxu2 %vm352_vm0, %v311_v48 }
 0x191   : > { %v373_v49 = vpop.f32.mrf.mxu2 }
 0x192   : > { %376 = vst [vmem:[%s258_s11] sm:$0xf] %v373_v49 }
 0x193 PF: > { %s15_s20 = sadd.s32 1, %s514_s20   ;;  %s695_s18 = smov %s510_s19 }
 0x194   : > { %p12_p5 = scmp.ge.s32.totalorder %s15_s20, 4   ;;  %s696_s19 = smov %s698_s21 }
 0x196   :  { %14 = sbr.rel (!%p12_p5) target bundleno = 2 (0x2), region = 70 }

</bundles_post_ra>
